<compile_context>
chip_gen: v7x
topology: tpu7x:2x2x1
jax: 0.10.0
libtpu: 0.0.40
codegen_flags: <defaults>
</compile_context>

<pallas_src>
import jax
import jax.numpy as jnp
from jax.experimental import pallas as pl
from jax.experimental.pallas import tpu as pltpu

NUM_ACTIONS = 4
COND_CHANNELS = 16   # embedding_dim
_LANES = 128
_SUBLANE = 16        # tile row multiple (safe for f32 and bf16 tables)


def _cdiv(a, b):
    return -(-a // b)


def _round_up(a, m):
    return _cdiv(a, m) * m


def _make_embedding_kernel(d_log2, bits, num_actions):
    mask = (1 << bits) - 1

    def kernel(packed_ref, tbl_ref, out_ref):
        # packed_ref: (tn, 1)   int32 — per output row, PER_ROW indices packed
        #                               `bits` bits each (slot s at bits [s*bits..))
        # tbl_ref:    (A, 128)  float — row k = emb_table[k] tiled PER_ROW times
        # out_ref:    (tn, 128) float — PER_ROW embeddings packed per 128-lane row
        tn, lanes = out_ref.shape
        packed = packed_ref[...]                                   # (tn, 1)
        tbl = tbl_ref[...]                                         # (A, 128)

        # Hoisted per-lane shift amount: lane l belongs to slot l >> d_log2.
        lane = jax.lax.broadcasted_iota(jnp.int32, (tn, lanes), 1)
        shift = (lane >> d_log2) * bits

        # Lane-replicated index: idx_lane[r, l] = index of slot (l // d) of row r.
        idx_lane = jnp.right_shift(packed, shift) & mask           # (tn, 128)

        # Unrolled VPU gather against the tiny resident table (A compares +
        # selects).  Out-of-range (sentinel) indices fall through to zero rows.
        acc = jnp.zeros((tn, lanes), jnp.float32)
        for k in range(num_actions):
            acc = jnp.where(idx_lane == k, tbl[k:k + 1, :].astype(jnp.float32), acc)
        out_ref[...] = acc.astype(out_ref.dtype)

    return kernel


def action_embedding(action_indices, emb_table, *,
                     block_rows=2048, min_pallas_elements=4096):
    """Equivalent of ActionEmbedding.forward(action_indices)."""
    orig_shape = action_indices.shape
    num_actions, d = emb_table.shape

    flat_idx = action_indices.reshape(-1).astype(jnp.int32)
    n = flat_idx.shape[0]
    if n == 0:
        return jnp.zeros(orig_shape + (d,), emb_table.dtype)

    # Lane packing / bit packing parameters (all divisors of 128 are powers of 2).
    per_row = _LANES // d if (_LANES % d == 0) else 0      # embeddings per 128-lane row
    bits = (32 // per_row) if per_row > 0 else 0           # bits per packed index
    pallas_ok = per_row > 0 and bits > 0 and num_actions < (1 << bits)

    if (not pallas_ok) or n < min_pallas_elements:
        # Small-N bypass (launch overhead dominates) / unsupported config.
        # NB: XLA gather clamps out-of-range indices (PyTorch would raise).
        return jnp.take(emb_table, flat_idx, axis=0).reshape(*orig_shape, d)

    sentinel = (1 << bits) - 1          # out-of-range value -> zero row in kernel
    d_log2 = d.bit_length() - 1

    # --- tile / grid selection -------------------------------------------------
    rows = _cdiv(n, per_row)
    # >=2 grid steps so v7x's two TensorCores both stream under the "parallel"
    # axis; cap the per-step output at ~block_rows rows (~1 MiB f32 at 2048).
    steps = max(2, _cdiv(rows, block_rows))
    tn = max(_SUBLANE, _round_up(_cdiv(rows, steps), _SUBLANE))
    rows_pad = steps * tn

    # --- compact, bit-packed index stream (1 int32 per output row) -------------
    valid = (flat_idx >= 0) & (flat_idx < num_actions)
    safe_idx = jnp.where(valid, flat_idx, sentinel)
    pad = rows_pad * per_row - n
    if pad:
        safe_idx = jnp.concatenate(
            [safe_idx, jnp.full((pad,), sentinel, jnp.int32)])
    idx2d = safe_idx.reshape(rows_pad, per_row)
    shifts = (jnp.arange(per_row, dtype=jnp.int32) * bits)[None, :]
    packed = jnp.sum(idx2d << shifts, axis=1, dtype=jnp.int32).reshape(rows_pad, 1)

    # Lane-packed table: tbl_packed[k, l] = emb_table[k, l % d]   (tiny: A x 128)
    tbl_packed = jnp.tile(emb_table, (1, per_row))

    out = pl.pallas_call(
        _make_embedding_kernel(d_log2, bits, num_actions),
        out_shape=jax.ShapeDtypeStruct((rows_pad, _LANES), emb_table.dtype),
        grid=(steps,),
        in_specs=[
            pl.BlockSpec((tn, 1), lambda i: (i, 0)),                 # packed indices
            pl.BlockSpec((num_actions, _LANES), lambda i: (0, 0)),   # resident table
        ],
        out_specs=pl.BlockSpec((tn, _LANES), lambda i: (i, 0)),
        compiler_params=pltpu.CompilerParams(
            dimension_semantics=("parallel",)),
    )(packed, tbl_packed)

    out = out.reshape(rows_pad * per_row, d)[:n]
    return out.reshape(*orig_shape, d)


if __name__ == "__main__":
    key = jax.random.PRNGKey(0)
    k_idx, k_emb, k_big = jax.random.split(key, 3)

    # Deterministic parameter init: nn.Embedding default is N(0, 1).
    emb_table = jax.random.normal(
        k_emb, (NUM_ACTIONS, COND_CHANNELS), dtype=jnp.float32)

    # 1) Module-sized input (batch=2, seq=8): takes the small-N XLA bypass.
    idx_small = jax.random.randint(
        k_idx, (2, 8), minval=0, maxval=NUM_ACTIONS, dtype=jnp.int32)
    out_small = jax.block_until_ready(action_embedding(idx_small, emb_table))
    assert out_small.shape == (2, 8, COND_CHANNELS), out_small.shape
    assert jnp.allclose(out_small, emb_table[idx_small])

    # 2) Same input with the Pallas path forced (exercise the kernel at module shape).
    out_forced = jax.block_until_ready(
        action_embedding(idx_small, emb_table, min_pallas_elements=0))
    assert out_forced.shape == (2, 8, COND_CHANNELS)
    assert out_forced.dtype == jnp.float32
    assert jnp.allclose(out_forced, emb_table[idx_small]), "pallas path mismatch"

    # 3) Larger batch: Pallas path with a 2-step parallel row grid.
    idx_big = jax.random.randint(
        k_big, (16, 256), minval=0, maxval=NUM_ACTIONS, dtype=jnp.int32)
    out_big = jax.block_until_ready(action_embedding(idx_big, emb_table))
    assert out_big.shape == (16, 256, COND_CHANNELS)
    assert jnp.allclose(out_big, emb_table[idx_big]), "pallas path mismatch (large)"

    print("KERNEL_OK")
</pallas_src>

<mosaic_0001>
module attributes {stable_mosaic.version = 11 : i64} {
  func.func @kernel(%arg0: i32, %arg1: memref<16x1xi32, #tpu.memory_space<vmem>>, %arg2: memref<4x128xf32, #tpu.memory_space<vmem>>, %arg3: memref<16x128xf32, #tpu.memory_space<vmem>>) attributes {dimension_semantics = [#tpu.dimension_semantics<parallel>], iteration_bounds = array<i64: 2>, scalar_prefetch = 0 : i64, scratch_operands = 0 : i64, tpu.core_type = #tpu.core_type<tc>, window_params = [{transform_indices = @transform_0, window_bounds = array<i64: 16, 1>}, {pipeline_mode = #tpu.pipeline_mode<synchronous>, transform_indices = @transform_1, window_bounds = array<i64: 4, 128>}, {transform_indices = @transform_2, window_bounds = array<i64: 16, 128>}]} {
    %c0 = arith.constant 0 : index
    %c0_0 = arith.constant 0 : index
    %0 = vector.load %arg1[%c0, %c0_0] : memref<16x1xi32, #tpu.memory_space<vmem>>, vector<16x1xi32>
    %c0_1 = arith.constant 0 : index
    %c0_2 = arith.constant 0 : index
    %1 = vector.load %arg2[%c0_1, %c0_2] : memref<4x128xf32, #tpu.memory_space<vmem>>, vector<4x128xf32>
    %2 = tpu.iota {dimensions = array<i32: 1>} : vector<16x128xi32>
    %c4_i32 = arith.constant 4 : i32
    %3 = vector.broadcast %c4_i32 : i32 to vector<16x128xi32>
    %4 = arith.shrsi %2, %3 : vector<16x128xi32>
    %c4_i32_3 = arith.constant 4 : i32
    %5 = vector.broadcast %c4_i32_3 : i32 to vector<16x128xi32>
    %6 = arith.muli %4, %5 : vector<16x128xi32>
    %7 = vector.broadcast %0 : vector<16x1xi32> to vector<16x128xi32>
    %8 = arith.shrsi %7, %6 : vector<16x128xi32>
    %c15_i32 = arith.constant 15 : i32
    %9 = vector.broadcast %c15_i32 : i32 to vector<16x128xi32>
    %10 = arith.andi %8, %9 : vector<16x128xi32>
    %cst = arith.constant 0.000000e+00 : f32
    %11 = vector.broadcast %cst : f32 to vector<16x128xf32>
    %c0_i32 = arith.constant 0 : i32
    %12 = vector.broadcast %c0_i32 : i32 to vector<16x128xi32>
    %13 = arith.cmpi eq, %10, %12 : vector<16x128xi32>
    %14 = vector.extract_strided_slice %1 {offsets = [0, 0], sizes = [1, 128], strides = [1, 1]} : vector<4x128xf32> to vector<1x128xf32>
    %15 = vector.shape_cast %14 : vector<1x128xf32> to vector<1x128xf32>
    %16 = vector.broadcast %15 : vector<1x128xf32> to vector<16x128xf32>
    %17 = arith.select %13, %16, %11 : vector<16x128xi1>, vector<16x128xf32>
    %c1_i32 = arith.constant 1 : i32
    %18 = vector.broadcast %c1_i32 : i32 to vector<16x128xi32>
    %19 = arith.cmpi eq, %10, %18 : vector<16x128xi32>
    %20 = vector.extract_strided_slice %1 {offsets = [1, 0], sizes = [1, 128], strides = [1, 1]} : vector<4x128xf32> to vector<1x128xf32>
    %21 = vector.shape_cast %20 : vector<1x128xf32> to vector<1x128xf32>
    %22 = vector.broadcast %21 : vector<1x128xf32> to vector<16x128xf32>
    %23 = arith.select %19, %22, %17 : vector<16x128xi1>, vector<16x128xf32>
    %c2_i32 = arith.constant 2 : i32
    %24 = vector.broadcast %c2_i32 : i32 to vector<16x128xi32>
    %25 = arith.cmpi eq, %10, %24 : vector<16x128xi32>
    %26 = vector.extract_strided_slice %1 {offsets = [2, 0], sizes = [1, 128], strides = [1, 1]} : vector<4x128xf32> to vector<1x128xf32>
    %27 = vector.shape_cast %26 : vector<1x128xf32> to vector<1x128xf32>
    %28 = vector.broadcast %27 : vector<1x128xf32> to vector<16x128xf32>
    %29 = arith.select %25, %28, %23 : vector<16x128xi1>, vector<16x128xf32>
    %c3_i32 = arith.constant 3 : i32
    %30 = vector.broadcast %c3_i32 : i32 to vector<16x128xi32>
    %31 = arith.cmpi eq, %10, %30 : vector<16x128xi32>
    %32 = vector.extract_strided_slice %1 {offsets = [3, 0], sizes = [1, 128], strides = [1, 1]} : vector<4x128xf32> to vector<1x128xf32>
    %33 = vector.shape_cast %32 : vector<1x128xf32> to vector<1x128xf32>
    %34 = vector.broadcast %33 : vector<1x128xf32> to vector<16x128xf32>
    %35 = arith.select %31, %34, %29 : vector<16x128xi1>, vector<16x128xf32>
    %c0_4 = arith.constant 0 : index
    %c0_5 = arith.constant 0 : index
    %36 = vector.load %arg3[%c0_4, %c0_5] : memref<16x128xf32, #tpu.memory_space<vmem>>, vector<16x128xf32>
    tpu.vector_store %arg3[%c0_4, %c0_5], %35 {strides = array<i32>} : memref<16x128xf32, #tpu.memory_space<vmem>>, vector<16x128xf32>,
    return
  }
  func.func @transform_0(%arg0: i32) -> (i32, i32) {
    %c0_i32 = arith.constant 0 : i32
    %c0_i32_0 = arith.constant 0 : i32
    return %arg0, %c0_i32 : i32, i32
  }
  func.func @transform_1(%arg0: i32) -> (i32, i32) {
    %c0_i32 = arith.constant 0 : i32
    %c0_i32_0 = arith.constant 0 : i32
    %c0_i32_1 = arith.constant 0 : i32
    return %c0_i32, %c0_i32_0 : i32, i32
  }
  func.func @transform_2(%arg0: i32) -> (i32, i32) {
    %c0_i32 = arith.constant 0 : i32
    %c0_i32_0 = arith.constant 0 : i32
    return %arg0, %c0_i32 : i32, i32
  }
}

</mosaic_0001>

<bundles_post_ra>
// kernel: tpu_custom_call.1
= control target key start
LH: loop header
LB: loop body
LE: loop exit
PB: predicated region body
PF: predicated region fallthrough
CT: control target
= control target key end

     0   :  { %7 = vsyncpa [#allocation3], 0  ;;  %s520_s0 = inlined_call_operand.vmem [shape: s32[32,1], index: 0, kind: input, shape index: {}]   ;;  %s521_s1 = inlined_call_operand.vmem [shape: f32[4,128], index: 1, kind: input, shape index: {}]   ;;  %s522_s2 = inlined_call_operand.hbm [shape: f32[32,128], index: 2, kind: output, shape index: {}]  }
   0x1   :  { %9 = vsyncpa [#allocation3 + $0x1], 0  ;;  %s411_s9 = smov 0   ;;  %s413_s10 = smov 0  }
   0x2   :  { %s415_s11 = smov 0   ;;  %s417_s12 = smov 0  }
   0x3 LB: > { %s432_s13 = sadd.s32 4294967295, %s390_s12   ;;  %s272_s14 = sadd.s32 4294967294, %s390_s12   ;;  %s390_s12 = sphi %s417_s12, %s528_s12   ;;  %s386_s11 = sphi %s415_s11, %s527_s11   ;;  %s382_s10 = sphi %s413_s10, %s526_s10   ;;  %s378_s9 = sphi %s411_s9, %s525_s9  }
   0x4   : > { %s436_s15 = sadd.s32 1, %s390_s12   ;;  %s69_s16 = sadd.s32 1, %s386_s11 }
   0x5   : > { %s66_s17 = ssub.s32 %s390_s12, %s436_s15  ;;  %p79_p0 = scmp.ne.s32.totalorder %s386_s11, %s382_s10 }
   0x6   : > { %p67_p1 = scmp.eq.s32.totalorder %s66_s17, 0  ;;  %p80_p2 = scmp.eq.s32.totalorder %s432_s13, 1 }
   0x7   : > { %p85_p3 = scmp.ne.s32.totalorder %s382_s10, %s378_s9  ;;  %p86_p4 = scmp.eq.s32.totalorder %s272_s14, 1 }
   0x8   : > { %s447_s18 = scalar_select %p67_p1, %s386_s11, %s69_s16  }
   0x9   : > { %p449_p5 = por %p80_p2, %p79_p0  ;;  %p453_p6 = por %p86_p4, %p85_p3 }
   0xa   : > { %p275_p7 = scmp.ge.s32.totalorder %s390_s12, 1  ;;  %p116_p8 = scmp.lt.s32.totalorder %s390_s12, 3 }
   0xc   : > { %p117_p9 = pnand %p275_p7, %p116_p8 }
   0xd   : > { %s277_s21 = sshll.u32 (!%p117_p9), %s432_s13, 1  ;;  %v392_v0 = vmov (!%p117_p9), 0   ;;  %v148_v3 = vlaneseq (!%p117_p9)  ;;  %v147_v9 = vld [vmem:[%s521_s1] sm:$0xf] (!%p117_p9)  ;;  %s135_s28 = sand.u32 (!%p117_p9), 1, %s382_s10  }
   0xe   : > { %120 = sbr.rel (%p117_p9) target bundleno = 181 (0xb5), region = 28  ;;  %327 = vset.pattern.permute.xlu0 (!%p117_p9), %v392_v0  ;;  %p139_p10 = scmp.lt.s32.totalorder (!%p117_p9), %s277_s21, 3 }
   0xf   : > { %v149_v4 = vand.u32 (!%p117_p9), 127, %v148_v3  ;;  %v165_v6 = vshrl.u32 (!%p117_p9), %v148_v3, 7  ;;  %s276_s29 = sshll.u32 (!%p117_p9), %s135_s28, 4  ;;  %s284_s30 = sshll.u32 (!%p117_p9), %s432_s13, 8 }
  0x10   : > { %s137_s3 = scalar_lea.vmem (!%p117_p9), [#allocation2], %s276_s29  ;;  %s473_s7 = scalar_lea.hbm (!%p117_p9), %s522_s2, %s284_s30 }
  0x11   : > { %v150_v5 = vshra.s32 (!%p117_p9), %v149_v4, 4  ;;  %v166_v8 = vsub.s32 (!%p117_p9), 0, %v165_v6  ;;  %v174_v10 = vsub.s32 (!%p117_p9), 1, %v165_v6  ;;  %v182_v11 = vsub.s32 (!%p117_p9), 2, %v165_v6  ;;  %s210_s4 = sshll.u32 (!%p117_p9), %s137_s3, 4  ;;  %s479_s8 = scalar_lea.sflag (!%p117_p9), [#allocation3], %s135_s28  ;;  %s475_s4 = int_to_ptr.vmem [resolvable:$true] %s210_s4 }
  0x12   : > { %v190_v13 = vsub.s32 (!%p117_p9), 3, %v165_v6  ;;  %s328_s13 = scalar_lea.vmem (!%p117_p9), %s475_s4, 256  ;;  %s393_s14 = smov (!%p117_p9), [#allocation2]  }
  0x13   : > { %v151_v7 = vmul.u32 (!%p117_p9), 4, %v150_v5  ;;  %v167_v15 = vrot.slane (!%p117_p9), %v147_v9, %v166_v8  ;;  %v175_v16 = vrot.slane (!%p117_p9), %v147_v9, %v174_v10  ;;  %v183_v18 = vrot.slane (!%p117_p9), %v147_v9, %v182_v11  ;;  %p329_p11 = scmp.ne.s32.totalorder (!%p117_p9), %s475_s4, %s328_s13  ;;  %s332_s16 = sshll.u32 (!%p117_p9), %s393_s14, 4  ;;  %s333_s16 = int_to_ptr.vmem [resolvable:$false] %s332_s16 }
  0x14   : > { %v191_v20 = vrot.slane (!%p117_p9), %v147_v9, %v190_v13  ;;  %s334_s17 = scalar_lea.vmem (!%p117_p9), %s333_s16, 512  ;;  %p335_p0 = scmp.lt.s32.totalorder (!%p117_p9), %s475_s4, %s333_s16 }
  0x15   : > { %s530_s21 = smov (!%p139_p10, %s277_s21), 3  ;;  %p330_p12 = pnand %p329_p11, %p449_p5 }
  0x16   : > { %s278_s22 = sshll.u32 %s530_s21, 3  ;;  %p336_p1 = scmp.lt.s32.totalorder %s334_s17, %s328_s13 }
  0x17   : > { %s142_s25 = scalar_lea.vmem %s520_s0, %s278_s22  ;;  %p331_p13 = pneg %p330_p12 }
  0x18   : > { %v145_v1 = vld [vmem:[%s142_s25] sm:$0xff]  ;;  %v146_v2 = vld [vmem:[%s142_s25 + $0x8] sm:$0xff]  ;;  %p337_p2 = por %p336_p1, %p335_p0 }
  0x19   : > { %153 = vperm.xlu0 %327, %v145_v1  }
  0x1a   : > { %p338_p3 = pnand %p337_p2, %p331_p13 }
  0x1d   : > { %156 = vperm.xlu0 %327, %v146_v2  }
  0x98   : > { %v154_v12 = vpop.permute.xlu0 %153 }
  0x99   : > { %v158_v14 = vshra.s32 %v154_v12, %v151_v7 }
  0x9b   : > { %v160_v17 = vand.u32 15, %v158_v14 }
  0x9c   : > { %v157_v19 = vpop.permute.xlu0 %156 }
  0x9d   : > { %vm162_vm0 = vcmp.eq.s32.totalorder %v160_v17, 0  ;;  %vm170_vm1 = vcmp.eq.s32.totalorder %v160_v17, 1  ;;  %v159_v22 = vshra.s32 %v157_v19, %v151_v7  ;;  %vm178_vm2 = vcmp.eq.s32.totalorder %v160_v17, 2 }
  0x9e   : > { %v168_v21 = vsel %vm162_vm0, %v167_v15, 0.0  ;;  %vm186_vm3 = vcmp.eq.s32.totalorder %v160_v17, 3 }
  0x9f   : > { %v176_v23 = vsel %vm170_vm1, %v175_v16, %v168_v21  ;;  %v161_v25 = vand.u32 15, %v159_v22 }
  0xa0   : > { %v184_v24 = vsel %vm178_vm2, %v183_v18, %v176_v23 }
  0xa1   : > { %v192_v26 = vsel %vm186_vm3, %v191_v20, %v184_v24  ;;  %vm163_vm4 = vcmp.eq.s32.totalorder %v161_v25, 0  ;;  %vm171_vm5 = vcmp.eq.s32.totalorder %v161_v25, 1  ;;  %vm179_vm6 = vcmp.eq.s32.totalorder %v161_v25, 2 }
  0xa2   : > { %194 = vst [vmem:[%s137_s3] sm:$0xff] %v192_v26  ;;  %v169_v27 = vsel %vm163_vm4, %v167_v15, 0.0  ;;  %vm187_vm7 = vcmp.eq.s32.totalorder %v161_v25, 3 }
  0xa3   : > { %v177_v28 = vsel %vm171_vm5, %v175_v16, %v169_v27 }
  0xa4   : > { %v185_v29 = vsel %vm179_vm6, %v183_v18, %v177_v28 }
  0xa5   : > { %v193_v30 = vsel %vm187_vm7, %v191_v20, %v185_v29 }
  0xa6   : > { %195 = vst [vmem:[%s137_s3 + $0x8] sm:$0xff] %v193_v30 }
  0xa7   : > { %341 = shalt.err (!%p338_p3)
}
  0xa8   : > { %s342_s21 = scalar_lea.hbm %s473_s7, 256  ;;  %s346_s24 = scalar_lea.hbm %s522_s2, 512 }
  0xa9   : > { %p343_p4 = scmp.ne.s32.totalorder %s473_s7, %s342_s21  ;;  %p347_p9 = scmp.lt.u32.totalorder %s473_s7, %s522_s2 }
  0xaa   : > { %p348_p10 = scmp.lt.u32.totalorder %s346_s24, %s342_s21  ;;  %p350_p12 = scmp.lt.u32.totalorder %s342_s21, %s473_s7 }
  0xab   : > { %p344_p7 = pnand %p343_p4, %p449_p5 }
  0xac   : > { %p349_p11 = por %p348_p10, %p347_p9 }
  0xad   : > { %p345_p8 = pneg %p344_p7 }
  0xae   : > { %p351_p13 = por %p350_p12, %p349_p11 }
  0xb0   : > { %p352_p0 = pnand %p351_p13, %p345_p8 }
  0xb2   : > { %355 = shalt.err (!%p352_p0)
}
  0xb3   : > { %s394_s27 = smov 128   ;;  %s395_s28 = smov 8  }
  0xb4   : > { %285 = dma.vmem_to_hbm [thread:$0]  (%p449_p5), %s475_s4, 256, %s473_s7, %s479_s8, %s394_s27, %s394_s27, %s395_s28  }
  0xb5 PF: > { %p291_p1 = scmp.ge.s32.totalorder %s390_s12, 2  ;;  %s225_s29 = sand.u32 1, %s378_s9  }
  0xb6   : > { %s226_s30 = scalar_lea.sflag [#allocation3], %s225_s29 }
  0xb7   : > { %p288_p2 = pnand %p291_p1, %p453_p6 }
  0xb9   : > { %373 = dma.done.wait (!%p288_p2), %s226_s30, 256  }
  0xba   : > { %375 = vsyncadd (!%p288_p2), %s226_s30, 4294967040  ;;  %p12_p3 = scmp.ge.s32.totalorder %s436_s15, 4   ;;  %s525_s9 = smov %s382_s10 }
  0xbb   : > { %s526_s10 = smov %s386_s11  ;;  %s527_s11 = smov %s447_s18 }
  0xbc   : > { %s528_s12 = smov %s436_s15  ;;  %14 = sbr.rel (!%p12_p3) target bundleno = 3 (0x3), region = 63 }
  0xc3   :  { %231 = vsyncpa [#allocation3], 1 }
  0xc4   :  { %233 = vsyncpa [#allocation3 + $0x1], 1 }

</bundles_post_ra>
